<compile_context>
chip_gen: v7x
topology: tpu7x:2x2x1
jax: 0.10.0
libtpu: 0.0.40
codegen_flags: <defaults>
</compile_context>

<pallas_src>
import functools

import jax
import jax.numpy as jnp
from jax.experimental import pallas as pl
from jax.experimental.pallas import tpu as pltpu


def _round_up(x, m):
    return ((x + m - 1) // m) * m


# ----------------------------- Pallas kernel --------------------------------
def _matmul_bias_kernel(a_ref, w_ref, b_ref, o_ref):
    # a_ref: (TM, Kp) bf16   w_ref: (Kp, Cp) bf16   b_ref: (1, Cp) f32
    # o_ref: (TM, Cp)  f32 -- Cp is a multiple of 128, so stores are lane-dense.
    acc = jnp.dot(a_ref[...], w_ref[...], preferred_element_type=jnp.float32)
    o_ref[...] = acc + b_ref[...]


def _matmul_bias(a, w, b, *, tm):
    Mp, Kp = a.shape
    _, Cp = w.shape
    assert Mp % tm == 0 and tm % 8 == 0
    assert Kp % 128 == 0 and Cp % 128 == 0

    cost = pl.CostEstimate(
        flops=2 * Mp * Kp * Cp,
        transcendentals=0,
        bytes_accessed=int(
            a.size * a.dtype.itemsize
            + w.size * w.dtype.itemsize
            + b.size * b.dtype.itemsize
            + Mp * Cp * 4
        ),
    )

    return pl.pallas_call(
        _matmul_bias_kernel,
        out_shape=jax.ShapeDtypeStruct((Mp, Cp), jnp.float32),
        grid_spec=pltpu.PrefetchScalarGridSpec(
            num_scalar_prefetch=0,
            grid=(Mp // tm,),
            in_specs=[
                pl.BlockSpec((tm, Kp), lambda i: (i, 0)),
                pl.BlockSpec((Kp, Cp), lambda i: (0, 0)),
                pl.BlockSpec((1, Cp), lambda i: (0, 0)),
            ],
            out_specs=pl.BlockSpec((tm, Cp), lambda i: (i, 0)),
        ),
        compiler_params=pltpu.CompilerParams(
            dimension_semantics=("parallel",),
        ),
        cost_estimate=cost,
    )(a, w, b)


# --------------------------- PrimaryCapsules ---------------------------------
class PrimaryCapsules:
    def __init__(self, input_shape=(4, 9, 9, 9), capsule_dim=8, out_channels=4,
                 kernel_size=3, stride=2, key=jax.random.PRNGKey(0)):
        self.input_shape = input_shape
        self.capsule_dim = capsule_dim
        self.out_channels = out_channels
        self.kernel_size = kernel_size
        self.stride = stride
        self.in_channels = input_shape[0]

        c_out_total = out_channels * capsule_dim
        k = kernel_size
        fan_in = self.in_channels * k * k * k
        bound = 1.0 / (fan_in ** 0.5)
        kw_key, kb_key = jax.random.split(key)
        # PyTorch Conv3d weight layout: (C_out, C_in, kD, kH, kW)
        self.weight = jax.random.uniform(
            kw_key, (c_out_total, self.in_channels, k, k, k),
            dtype=jnp.float32, minval=-bound, maxval=bound)
        self.bias = jax.random.uniform(
            kb_key, (c_out_total,), dtype=jnp.float32,
            minval=-bound, maxval=bound)

    def _im2col(self, x):
        # x: (N, C_in, D, H, W) -> (M, K) patches, K ordered (ci, kd, kh, kw).
        # Cast to bf16 up front so patch extraction / transpose move half the
        # bytes and A is already in the MXU-native dtype.
        x = x.astype(jnp.bfloat16)
        N, C, D, H, W = x.shape
        k, s = self.kernel_size, self.stride
        OD = (D - k) // s + 1
        OH = (H - k) // s + 1
        OW = (W - k) // s + 1
        cols = []
        for kd in range(k):
            for kh in range(k):
                for kw in range(k):
                    patch = x[:, :,
                              kd:kd + s * OD:s,
                              kh:kh + s * OH:s,
                              kw:kw + s * OW:s]          # (N, C, OD, OH, OW)
                    cols.append(patch)
        # (k^3, N, C, OD, OH, OW) -> (N, OD, OH, OW, C, k^3)
        p = jnp.stack(cols, axis=0)
        p = jnp.transpose(p, (1, 3, 4, 5, 2, 0))
        M = N * OD * OH * OW
        K = C * k * k * k
        return p.reshape(M, K), (N, OD, OH, OW)

    @functools.partial(jax.jit, static_argnums=0)
    def __call__(self, x):
        # x: (N, C_in, D, H, W) float32
        a, (N, OD, OH, OW) = self._im2col(x)              # (M, K) bf16
        k = self.kernel_size
        c_out = self.out_channels * self.capsule_dim
        K = self.in_channels * k * k * k
        M = a.shape[0]

        # Lane-align the contraction and output dims.
        Kp = _round_up(K, 128)
        Cp = _round_up(c_out, 128)

        # Capped, 8-aligned M tile; pad M so the grid divides evenly.
        tm = min(256, _round_up(M, 8))
        Mp = _round_up(M, tm)

        a_p = jnp.pad(a, ((0, Mp - M), (0, Kp - K)))      # bf16, zero-padded
        # weight (C_out, C_in*k^3) -> (K, C_out), same (ci, kd, kh, kw) ordering
        w_flat = self.weight.reshape(c_out, K).T.astype(jnp.bfloat16)
        w_p = jnp.pad(w_flat, ((0, Kp - K), (0, Cp - c_out)))
        b_p = jnp.pad(self.bias.reshape(1, c_out), ((0, 0), (0, Cp - c_out)))

        out = _matmul_bias(a_p, w_p, b_p, tm=tm)          # (Mp, Cp) f32
        out = out[:M, :c_out]

        # == permute(0,2,3,4,1).view(N, OD, OH, OW, out_channels, capsule_dim)
        return out.reshape(N, OD, OH, OW, self.out_channels, self.capsule_dim)


# -------------------------------- main ---------------------------------------
if __name__ == "__main__":
    key = jax.random.PRNGKey(0)
    k_param, k_x = jax.random.split(key)

    # Small shapes consistent with the module: in_channels=4, spatial 9^3,
    # kernel=3, stride=2 -> output spatial 4^3; out_channels=4, capsule_dim=8.
    N, C_in, D = 2, 4, 9
    module = PrimaryCapsules(input_shape=(C_in, D, D, D), capsule_dim=8,
                             out_channels=4, kernel_size=3, stride=2,
                             key=k_param)

    x = jax.random.normal(k_x, (N, C_in, D, D, D), dtype=jnp.float32)

    out = module(x)
    out = jax.block_until_ready(out)

    # Reference check against XLA's conv (same semantics as torch Conv3d, no pad).
    # Tolerance reflects bf16 MXU operands with f32 accumulation.
    ref = jax.lax.conv_general_dilated(
        x, module.weight, window_strides=(2, 2, 2), padding="VALID",
        dimension_numbers=("NCDHW", "OIDHW", "NCDHW"))
    ref = ref + module.bias.reshape(1, -1, 1, 1, 1)
    ref = jnp.transpose(ref, (0, 2, 3, 4, 1)).reshape(out.shape)

    assert out.shape == (N, 4, 4, 4, 4, 8), out.shape
    assert jnp.allclose(out, ref, atol=2e-2, rtol=2e-2), float(
        jnp.max(jnp.abs(out - ref)))

    print("KERNEL_OK")
</pallas_src>

<mosaic_0001>
module attributes {stable_mosaic.version = 11 : i64} {
  func.func @_matmul_bias_kernel(%arg0: i32, %arg1: memref<128x128xbf16, #tpu.memory_space<vmem>>, %arg2: memref<128x128xbf16, #tpu.memory_space<vmem>>, %arg3: memref<1x128xf32, #tpu.memory_space<vmem>>, %arg4: memref<128x128xf32, #tpu.memory_space<vmem>>) attributes {dimension_semantics = [#tpu.dimension_semantics<parallel>], iteration_bounds = array<i64: 1>, scalar_prefetch = 0 : i64, scratch_operands = 0 : i64, tpu.core_type = #tpu.core_type<tc>, window_params = [{transform_indices = @transform_0, window_bounds = array<i64: 128, 128>}, {pipeline_mode = #tpu.pipeline_mode<synchronous>, transform_indices = @transform_1, window_bounds = array<i64: 128, 128>}, {pipeline_mode = #tpu.pipeline_mode<synchronous>, transform_indices = @transform_2, window_bounds = array<i64: 1, 128>}, {transform_indices = @transform_3, window_bounds = array<i64: 128, 128>}]} {
    %c0 = arith.constant 0 : index
    %c0_0 = arith.constant 0 : index
    %0 = vector.load %arg1[%c0, %c0_0] : memref<128x128xbf16, #tpu.memory_space<vmem>>, vector<128x128xbf16>
    %c0_1 = arith.constant 0 : index
    %c0_2 = arith.constant 0 : index
    %1 = vector.load %arg2[%c0_1, %c0_2] : memref<128x128xbf16, #tpu.memory_space<vmem>>, vector<128x128xbf16>
    %cst = arith.constant dense<0.000000e+00> : vector<128x128xf32>
    %2 = tpu.matmul %0, %1, %cst {dimension_numbers = #tpu.dot_dimension_numbers<[1], [0], [0], [1], [0, 0, 1, 1], [], []>} : vector<128x128xbf16>, vector<128x128xbf16>, vector<128x128xf32> -> vector<128x128xf32>
    %c0_3 = arith.constant 0 : index
    %c0_4 = arith.constant 0 : index
    %3 = vector.load %arg3[%c0_3, %c0_4] : memref<1x128xf32, #tpu.memory_space<vmem>>, vector<1x128xf32>
    %4 = vector.broadcast %3 : vector<1x128xf32> to vector<128x128xf32>
    %5 = arith.addf %2, %4 : vector<128x128xf32>
    %c0_5 = arith.constant 0 : index
    %c0_6 = arith.constant 0 : index
    %6 = vector.load %arg4[%c0_5, %c0_6] : memref<128x128xf32, #tpu.memory_space<vmem>>, vector<128x128xf32>
    tpu.vector_store %arg4[%c0_5, %c0_6], %5 {strides = array<i32>} : memref<128x128xf32, #tpu.memory_space<vmem>>, vector<128x128xf32>,
    return
  }
  func.func @transform_0(%arg0: i32) -> (i32, i32) {
    %c0_i32 = arith.constant 0 : i32
    %c0_i32_0 = arith.constant 0 : i32
    return %arg0, %c0_i32 : i32, i32
  }
  func.func @transform_1(%arg0: i32) -> (i32, i32) {
    %c0_i32 = arith.constant 0 : i32
    %c0_i32_0 = arith.constant 0 : i32
    %c0_i32_1 = arith.constant 0 : i32
    return %c0_i32, %c0_i32_0 : i32, i32
  }
  func.func @transform_2(%arg0: i32) -> (i32, i32) {
    %c0_i32 = arith.constant 0 : i32
    %c0_i32_0 = arith.constant 0 : i32
    %c0_i32_1 = arith.constant 0 : i32
    return %c0_i32, %c0_i32_0 : i32, i32
  }
  func.func @transform_3(%arg0: i32) -> (i32, i32) {
    %c0_i32 = arith.constant 0 : i32
    %c0_i32_0 = arith.constant 0 : i32
    return %arg0, %c0_i32 : i32, i32
  }
}

</mosaic_0001>

<bundles_post_ra>
// kernel: a_call__.1
= control target key start
LH: loop header
LB: loop body
LE: loop exit
PB: predicated region body
PF: predicated region fallthrough
CT: control target
= control target key end

     0   :  { %s483_s1 = inlined_call_operand.vmem [shape: bf16[128,128], index: 1, kind: input, shape index: {}]   ;;  %s484_s0 = inlined_call_operand.vmem [shape: bf16[128,128], index: 0, kind: input, shape index: {}]   ;;  %s485_s2 = inlined_call_operand.vmem [shape: f32[1,128], index: 2, kind: input, shape index: {}]   ;;  %s486_s3 = inlined_call_operand.vmem [shape: f32[128,128], index: 3, kind: output, shape index: {}]  }
   0x1   :  { %v348_v0 = vld [vmem:[%s483_s1] sm:$0xff]   ;;  %v349_v1 = vld [vmem:[%s483_s1 + $0x8] sm:$0xff]   ;;  %v350_v2 = vld [vmem:[%s483_s1 + $0x10] sm:$0xff]  }
   0x2   :  { %300 = vmatprep.subr.bf16.mxu0 %v348_v0  ;;  %332 = vmatprep.subr.bf16.mxu1 %v348_v0  ;;  %v351_v3 = vld [vmem:[%s483_s1 + $0x18] sm:$0xff]   ;;  %v356_v4 = vld [vmem:[%s484_s0] sm:$0xff]   ;;  %v353_v7 = vld [vmem:[%s483_s1 + $0x28] sm:$0xff]  }
   0x3   :  { %301 = vmatpush3.bf16.msra.mxu0 %v348_v0  ;;  %340 = vmatpush3.bf16.msra.mxu1 %v348_v0  ;;  %v357_v5 = vld [vmem:[%s484_s0 + $0x20] sm:$0xff]   ;;  %v354_v8 = vld [vmem:[%s483_s1 + $0x30] sm:$0xff]   ;;  %v355_v9 = vld [vmem:[%s483_s1 + $0x38] sm:$0xff]  }
   0x4   :  { %302 = vmatprep.subr.bf16.mxu0 %v349_v1  ;;  %333 = vmatprep.subr.bf16.mxu1 %v349_v1  ;;  %v352_v6 = vld [vmem:[%s483_s1 + $0x20] sm:$0xff]   ;;  %v358_v10 = vld [vmem:[%s484_s0 + $0x8] sm:$0xff]   ;;  %v360_v12 = vld [vmem:[%s484_s0 + $0x10] sm:$0xff]  }
   0x5   :  { %316 = vmatprep.mubr.bf16.mxu0 %v356_v4  ;;  %324 = vmatprep.mubr.bf16.mxu1 %v357_v5  ;;  %v359_v11 = vld [vmem:[%s484_s0 + $0x28] sm:$0xff]   ;;  %v361_v13 = vld [vmem:[%s484_s0 + $0x30] sm:$0xff]   ;;  %v362_v14 = vld [vmem:[%s484_s0 + $0x18] sm:$0xff]  }
   0x6   :  { %v363_v15 = vld [vmem:[%s484_s0 + $0x38] sm:$0xff]   ;;  %v267_v16 = vld [vmem:[%s485_s2] ss:$0 sm:$0xff] }
   0x7   :  { %303 = vmatpush3.bf16.msra.mxu0 %v349_v1  ;;  %341 = vmatpush3.bf16.msra.mxu1 %v349_v1 }
   0x8   :  { %304 = vmatprep.subr.bf16.mxu0 %v350_v2  ;;  %334 = vmatprep.subr.bf16.mxu1 %v350_v2 }
   0xb   :  { %305 = vmatpush3.bf16.msra.mxu0 %v350_v2  ;;  %342 = vmatpush3.bf16.msra.mxu1 %v350_v2 }
   0xc   :  { %306 = vmatprep.subr.bf16.mxu0 %v351_v3  ;;  %335 = vmatprep.subr.bf16.mxu1 %v351_v3 }
   0xf   :  { %307 = vmatpush3.bf16.msra.mxu0 %v351_v3  ;;  %343 = vmatpush3.bf16.msra.mxu1 %v351_v3 }
  0x10   :  { %308 = vmatprep.subr.bf16.mxu0 %v352_v6  ;;  %336 = vmatprep.subr.bf16.mxu1 %v352_v6 }
  0x13   :  { %309 = vmatpush3.bf16.msra.mxu0 %v352_v6  ;;  %344 = vmatpush3.bf16.msra.mxu1 %v352_v6 }
  0x14   :  { %310 = vmatprep.subr.bf16.mxu0 %v353_v7  ;;  %337 = vmatprep.subr.bf16.mxu1 %v353_v7 }
  0x17   :  { %311 = vmatpush3.bf16.msra.mxu0 %v353_v7  ;;  %345 = vmatpush3.bf16.msra.mxu1 %v353_v7 }
  0x18   :  { %312 = vmatprep.subr.bf16.mxu0 %v354_v8  ;;  %338 = vmatprep.subr.bf16.mxu1 %v354_v8 }
  0x1b   :  { %313 = vmatpush3.bf16.msra.mxu0 %v354_v8  ;;  %346 = vmatpush3.bf16.msra.mxu1 %v354_v8 }
  0x1c   :  { %314 = vmatprep.subr.bf16.mxu0 %v355_v9  ;;  %339 = vmatprep.subr.bf16.mxu1 %v355_v9 }
  0x1f   :  { %315 = vmatpush3.bf16.msra.mxu0 %v355_v9  ;;  %347 = vmatpush3.bf16.msra.mxu1 %v355_v9 }
  0x22   :  { %317 = vmatmul.mubr.bf16.vlgmr.msra.gmra.mrb[0].mxu0 %v358_v10  ;;  %325 = vmatmul.mubr.bf16.vlgmr.msra.gmra.mrb[0].mxu1 %v359_v11 }
  0x23   :  { %320 = vmatprep.mubr.bf16.mxu0 %v360_v12  ;;  %328 = vmatprep.mubr.bf16.mxu1 %v361_v13 }
  0x2a   :  { %321 = vmatmul.mubr.bf16.gmra.mrb[4].mxu0 %v362_v14  ;;  %329 = vmatmul.mubr.bf16.gmra.mrb[4].mxu1 %v363_v15 }
  0xf5   :  { %v318_v17 = vpop.f32.mrb[0].mxu0  ;;  %v326_v18 = vpop.f32.mrb[0].mxu1 }
  0xf6   :  { %v193_v19 = vadd.f32 %v318_v17, %v267_v16  ;;  %v225_v20 = vadd.f32 %v326_v18, %v267_v16  ;;  %v184_v21 = vpop.f32.mrb[1].mxu0  ;;  %v216_v22 = vpop.f32.mrb[1].mxu1 }
  0xf7   :  { %v185_v23 = vadd.f32 %v267_v16, %v184_v21  ;;  %v217_v24 = vadd.f32 %v267_v16, %v216_v22  ;;  %v319_v25 = vpop.f32.mrb[2].mxu0  ;;  %v327_v26 = vpop.f32.mrb[2].mxu1 }
  0xf8   :  { %249 = vst [vmem:[%s486_s3 + $0x10] sm:$0xff] %v193_v19  ;;  %257 = vst [vmem:[%s486_s3 + $0x50] sm:$0xff] %v225_v20  ;;  %v196_v27 = vadd.f32 %v319_v25, %v267_v16  ;;  %v228_v28 = vadd.f32 %v327_v26, %v267_v16  ;;  %v187_v29 = vpop.f32.mrb[3].mxu0  ;;  %v219_v30 = vpop.f32.mrb[3].mxu1 }
  0xf9   :  { %247 = vst [vmem:[%s486_s3] sm:$0xff] %v185_v23  ;;  %255 = vst [vmem:[%s486_s3 + $0x40] sm:$0xff] %v217_v24  ;;  %v188_v31 = vadd.f32 %v267_v16, %v187_v29  ;;  %v220_v32 = vadd.f32 %v267_v16, %v219_v30 }
  0xfa   :  { %250 = vst [vmem:[%s486_s3 + $0x18] sm:$0xff] %v196_v27  ;;  %258 = vst [vmem:[%s486_s3 + $0x58] sm:$0xff] %v228_v28 }
  0xfb   :  { %248 = vst [vmem:[%s486_s3 + $0x8] sm:$0xff] %v188_v31  ;;  %256 = vst [vmem:[%s486_s3 + $0x48] sm:$0xff] %v220_v32 }
  0xfd   :  { %v322_v33 = vpop.f32.mrb[4].mxu0  ;;  %v330_v34 = vpop.f32.mrb[4].mxu1 }
  0xfe   :  { %v209_v35 = vadd.f32 %v322_v33, %v267_v16  ;;  %v241_v36 = vadd.f32 %v330_v34, %v267_v16  ;;  %v200_v37 = vpop.f32.mrb[5].mxu0  ;;  %v232_v38 = vpop.f32.mrb[5].mxu1 }
  0xff   :  { %v201_v39 = vadd.f32 %v267_v16, %v200_v37  ;;  %v233_v40 = vadd.f32 %v267_v16, %v232_v38  ;;  %v323_v41 = vpop.f32.mrb[6].mxu0  ;;  %v331_v42 = vpop.f32.mrb[6].mxu1 }
 0x100   :  { %253 = vst [vmem:[%s486_s3 + $0x30] sm:$0xff] %v209_v35  ;;  %261 = vst [vmem:[%s486_s3 + $0x70] sm:$0xff] %v241_v36  ;;  %v212_v43 = vadd.f32 %v323_v41, %v267_v16  ;;  %v244_v44 = vadd.f32 %v331_v42, %v267_v16  ;;  %v203_v45 = vpop.f32.mrb[7].mxu0  ;;  %v235_v46 = vpop.f32.mrb[7].mxu1 }
 0x101   :  { %251 = vst [vmem:[%s486_s3 + $0x20] sm:$0xff] %v201_v39  ;;  %259 = vst [vmem:[%s486_s3 + $0x60] sm:$0xff] %v233_v40  ;;  %v204_v47 = vadd.f32 %v267_v16, %v203_v45  ;;  %v236_v48 = vadd.f32 %v267_v16, %v235_v46 }
 0x102   :  { %254 = vst [vmem:[%s486_s3 + $0x38] sm:$0xff] %v212_v43  ;;  %262 = vst [vmem:[%s486_s3 + $0x78] sm:$0xff] %v244_v44 }
 0x103   :  { %252 = vst [vmem:[%s486_s3 + $0x28] sm:$0xff] %v204_v47  ;;  %260 = vst [vmem:[%s486_s3 + $0x68] sm:$0xff] %v236_v48 }

</bundles_post_ra>
